<compile_context>
chip_gen: v5e
topology: v5e:2x2
jax: 0.10.0
libtpu: 0.0.40
codegen_flags: <defaults>
</compile_context>

<pallas_src>
import jax
import jax.numpy as jnp
from jax.experimental import pallas as pl
from jax.experimental.pallas import tpu as pltpu


def _dma_identity_kernel(x_hbm_ref, o_hbm_ref, sem):
    # Single direct HBM->HBM DMA of the whole tensor (no VMEM bounce, no vld/vst).
    cp = pltpu.make_async_copy(x_hbm_ref, o_hbm_ref, sem)
    cp.start()
    cp.wait()


def _pallas_identity_copy(x: jax.Array) -> jax.Array:
    """Materialize a copy of `x` via a single HBM->HBM DMA inside a Pallas kernel."""
    return pl.pallas_call(
        _dma_identity_kernel,
        out_shape=jax.ShapeDtypeStruct(x.shape, x.dtype),
        in_specs=[pl.BlockSpec(memory_space=pl.ANY)],
        out_specs=pl.BlockSpec(memory_space=pl.ANY),
        scratch_shapes=[pltpu.SemaphoreType.DMA],
    )(x)


def identity_wrapper_forward(x: jax.Array, *, force_kernel: bool = False) -> jax.Array:
    """Pallas implementation of IdentityWrapper.forward for a single tensor arg.

    Default path: pure pass-through (return x) — zero HBM traffic, which is the
    correct and fastest realization of an identity forward on every TPU generation.
    Set force_kernel=True to route through the Pallas HBM->HBM DMA copy kernel
    (used when a physically distinct output buffer is required, and in __main__ to
    exercise the kernel).
    """
    if x.size == 0:
        return x
    if not force_kernel:
        return x
    return _pallas_identity_copy(x)


if __name__ == "__main__":
    key = jax.random.PRNGKey(0)
    # Small shape consistent with a diffusion-model latent input: NCHW = (2, 4, 16, 16)
    x = jax.random.normal(key, (2, 4, 16, 16), dtype=jnp.float32)

    # 1) Default (optimal) path: pure pass-through, no kernel launched.
    y_fast = identity_wrapper_forward(x)
    assert y_fast.shape == x.shape and y_fast.dtype == x.dtype
    assert bool(jnp.array_equal(y_fast, x))

    # 2) Kernel path: single HBM->HBM DMA copy through Pallas.
    fwd_kernel = jax.jit(lambda t: identity_wrapper_forward(t, force_kernel=True))
    y_kern = jax.block_until_ready(fwd_kernel(x))
    assert y_kern.shape == x.shape and y_kern.dtype == x.dtype
    assert bool(jnp.array_equal(y_kern, x))

    # 3) Kernel path on a ragged, non-(8,128)-aligned shape/dtype: the DMA copy
    #    needs no padding, reshaping, or slice-back.
    x2 = jax.random.normal(jax.random.PRNGKey(1), (3, 5, 7), dtype=jnp.bfloat16)
    y2 = jax.block_until_ready(fwd_kernel(x2))
    assert y2.shape == x2.shape and y2.dtype == x2.dtype
    assert bool(jnp.array_equal(y2, x2))

    print("KERNEL_OK")
</pallas_src>

<mosaic_0001>
module attributes {stable_mosaic.version = 11 : i64} {
  func.func @_dma_identity_kernel(%arg0: memref<2x4x16x16xf32, #tpu.memory_space<any>>, %arg1: memref<2x4x16x16xf32, #tpu.memory_space<any>>, %arg2: memref<!tpu.dma_semaphore, #tpu.memory_space<semaphore_mem>>) attributes {dimension_semantics = [], scalar_prefetch = 0 : i64, scratch_operands = 1 : i64, tpu.core_type = #tpu.core_type<tc>} {
    tpu.enqueue_dma source(%arg0 : memref<2x4x16x16xf32, #tpu.memory_space<any>>) target(%arg1 : memref<2x4x16x16xf32, #tpu.memory_space<any>>) target_semaphore(%arg2 : memref<!tpu.dma_semaphore, #tpu.memory_space<semaphore_mem>>)
    tpu.wait_dma2 semaphore(%arg2 : memref<!tpu.dma_semaphore, #tpu.memory_space<semaphore_mem>>) src(%arg0 : memref<2x4x16x16xf32, #tpu.memory_space<any>>) dst(%arg1 : memref<2x4x16x16xf32, #tpu.memory_space<any>>)
    return
  }
}

</mosaic_0001>

<bundles_post_ra>
// kernel: _lambda_.1
= control target key start
LH: loop header
LB: loop body
LE: loop exit
PB: predicated region body
PF: predicated region fallthrough
CT: control target
= control target key end

     0   :  { %s34_s12 = smov [#allocation2]   ;;  %s35_s13 = smov [#allocation3]   ;;  %s53_s0 = inlined_call_operand.hbm [shape: f32[2,4,16,16], index: 0, kind: input, shape index: {}]   ;;  %s54_s1 = inlined_call_operand.hbm [shape: f32[2,4,16,16], index: 1, kind: output, shape index: {}]  }
   0x1   :  { %s10_s8 = sshll.u32 %s53_s0, 4  ;;  %s12_s11 = sshll.u32 %s54_s1, 4  ;;  %s11_s8 = int_to_ptr.hbm [resolvable:$true] %s10_s8  ;;  %s13_s11 = int_to_ptr.hbm [resolvable:$true] %s12_s11 }
   0x2   :  { %s36_s14 = smov 0  }
   0x3   :  { %16 = dma.general %s11_s8, 2048, %s13_s11, %s34_s12, %s35_s13, [#allocation4], %s36_s14, 0  }
   0x4   :  { %32 = dma.done.wait [#allocation2], 2048 }
   0x5   :  { %33 = vsyncadd [#allocation2], 4294965248 }
   0x6   :  { %22 = vsyncmov [#allocation2] }
   0x9   :  { %s23_s15 = vpop.sfrf %22 }
   0xa   :  { %p28_p0 = scmp.ne.s32.totalorder %s23_s15, 0 }
   0xc   :  { %27 = shalt.err (%p28_p0)  }

</bundles_post_ra>
